<compile_context>
chip_gen: v6e
topology: v6e:2x2x1
jax: 0.10.0
libtpu: 0.0.40
codegen_flags: <defaults>
</compile_context>

<pallas_src>
import functools

import jax
import jax.numpy as jnp
from jax.experimental import pallas as pl
from jax.experimental.pallas import tpu as pltpu


def _divisors(n):
    return [k for k in range(1, n + 1) if n % k == 0]


def _vmem_capacity_bytes():
    try:
        return int(pltpu.get_tpu_info().vmem_capacity_bytes)
    except Exception:
        return 64 << 20            # conservative default (v7x per-TC VMEM)


def _pick_tiles(bc, max_disp, out_unit, in_unit, budget):
    """Pick (Ct, Dt) with Ct | bc and Dt | max_disp.

    Dt is a multiple of 4 whenever the disparity axis is actually chunked
    (keeps the phase index static inside a chunk); a single chunk
    (Dt == max_disp) is always legal and makes every slice start static too.
    """
    # Disparity-chunk candidates (ascending).  Cap the in-kernel unroll at 32.
    dt_cands = sorted(k for k in _divisors(max_disp) if k % 4 == 0 and k <= 32)
    if not dt_cands:
        # max_disp has no multiple-of-4 divisor (rare in practice) -> one
        # static chunk.
        # TODO(synk): support Dt % 4 != 0 chunks (dynamic phase index) so a
        # huge non-multiple-of-4 max_disp does not fall back to a full unroll.
        dt_cands = [max_disp]

    dt = dt_cands[0]
    for k in dt_cands:                       # largest Dt that fits with Ct=1
        if 2 * (k * out_unit + in_unit) <= budget:
            dt = k

    target_out_block = 8 << 20               # ~8 MiB output block per step
    ct = 1
    for c in sorted(_divisors(bc)):          # grow Ct while it still fits
        if (2 * c * (dt * out_unit + in_unit) <= budget
                and c * dt * out_unit <= 2 * target_out_block):
            ct = c
    return ct, dt


def _diff_volume_kernel(left_ref, eph_ref, out_ref, *, dt, pad, wl,
                        static_chunk):
    """Emit Dt disparity planes for Ct feature planes.

    left_ref : (Ct, H, Wl)            left feature planes
    eph_ref  : (Ct, 4, H, pad + Wl)   stride-4 phases of right; every row is
                                      left-padded with `pad` copies of the
                                      clamp value right[..., 0]
    out_ref  : (Ct, Dt, H, Wl)        disparity chunk [j*Dt, (j+1)*Dt)
    """
    if static_chunk:
        base_sh = 0                               # single chunk: all static
    else:
        # Chunks start at multiples of 4 (Dt % 4 == 0), so the phase index
        # below is static and only the slice start depends on the chunk id.
        base_sh = pl.program_id(1) * (dt // 4)

    for dd in range(dt):                          # small static unroll (<=32)
        p = (1 - dd) % 4                          # static phase index
        start = (pad - (dd + 2) // 4) - base_sh   # slice start, always >= 0
        gathered = eph_ref[:, p, :, pl.ds(start, wl)]
        out_ref[:, dd, :, :] = left_ref[...] - gathered


def diff_volume_v2(left_feature, right_feature, max_disp, *,
                   block_ct=None, block_dt=None):
    """Pallas implementation of DiffVolumeV2.forward.

    left_feature : (B, C, H, Wl)
    right_feature: (B, C, H, Wr)
    returns      : (B, C, max_disp, H, Wl), dtype of left_feature
    """
    B, C, H, Wl = left_feature.shape
    Bb, Cc, Hh, Wr = right_feature.shape
    assert (B, C, H) == (Bb, Cc, Hh)
    dtype = left_feature.dtype
    right_feature = right_feature.astype(dtype)

    BC = B * C
    W4 = 4 * Wl
    pad = (max_disp + 1) // 4          # max shift (d+2)//4 over d < max_disp
    padW = pad + Wl
    itemsize = jnp.dtype(dtype).itemsize

    # ---- Wrapper-side one-time preprocessing (O(input), << output size) ----
    # Upper clip (idx > Wr - 1): restrict / edge-replicate right to the index
    # range the op can touch ([0, 4*Wl - 3]).
    right = right_feature.reshape(BC, H, Wr)
    if Wr >= W4:
        right_used = right[..., :W4]
    else:
        edge = jnp.broadcast_to(right[..., Wr - 1:Wr], (BC, H, W4 - Wr))
        right_used = jnp.concatenate([right, edge], axis=-1)

    # Stride-4 phases: phases[:, p, h, x] = right_used[:, h, 4*x + p].
    phases = right_used.reshape(BC, H, Wl, 4).transpose(0, 3, 1, 2)

    # Lower clip (idx < 0): left-pad every row of every phase with the clamp
    # value right[..., 0].  After this the per-disparity gather is a plain
    # slice -- no right0 plane, no column map, no select inside the kernel.
    if pad > 0:
        clamp = jnp.broadcast_to(right[:, None, :, 0:1], (BC, 4, H, pad))
        eph = jnp.concatenate([clamp, phases], axis=-1)
    else:
        eph = phases
    left3 = left_feature.reshape(BC, H, Wl)

    # ---- Tiling: cap the double-buffered working set to the device VMEM ----
    out_unit = H * Wl * itemsize                      # one (h, x) plane
    in_unit = (H * Wl + 4 * H * padW) * itemsize      # left + phases at Ct=1
    vmem_cap = _vmem_capacity_bytes()
    budget = max(min(vmem_cap * 3 // 4, vmem_cap - (16 << 20)), 16 << 20)
    ct, dt = _pick_tiles(BC, max_disp, out_unit, in_unit, budget)
    if block_ct is not None:                          # test / tuning overrides
        ct = block_ct
    if block_dt is not None:
        dt = block_dt
    assert BC % ct == 0 and max_disp % dt == 0
    grid_bc, grid_d = BC // ct, max_disp // dt
    assert grid_d == 1 or dt % 4 == 0
    static_chunk = (grid_d == 1)

    foot = 2 * ct * (dt * out_unit + in_unit)         # double-buffered blocks
    vmem_limit = int(min(max(foot + (8 << 20), 16 << 20),
                         vmem_cap - (2 << 20)))
    # TODO(synk): for gigantic single planes (H*Wl so large that even
    # (Ct=1, Dt=4) overflows the budget), also chunk the H axis.

    out_bytes = BC * max_disp * H * Wl * itemsize
    in_bytes = (BC * H * Wl + BC * 4 * H * padW) * itemsize
    cost = pl.CostEstimate(flops=BC * max_disp * H * Wl, transcendentals=0,
                           bytes_accessed=int(out_bytes + in_bytes))

    kernel = functools.partial(_diff_volume_kernel, dt=dt, pad=pad, wl=Wl,
                               static_chunk=static_chunk)

    out = pl.pallas_call(
        kernel,
        out_shape=jax.ShapeDtypeStruct((BC, max_disp, H, Wl), dtype),
        grid=(grid_bc, grid_d),
        in_specs=[
            # Resident across the disparity-chunk axis: re-DMA'd only when the
            # B*C block index changes (their index maps ignore j).
            pl.BlockSpec((ct, H, Wl), lambda n, j: (n, 0, 0)),
            pl.BlockSpec((ct, 4, H, padW), lambda n, j: (n, 0, 0, 0)),
        ],
        out_specs=pl.BlockSpec((ct, dt, H, Wl), lambda n, j: (n, j, 0, 0)),
        compiler_params=pltpu.CompilerParams(
            dimension_semantics=("parallel", "parallel"),
            vmem_limit_bytes=vmem_limit),
        cost_estimate=cost,
    )(left3, eph)

    # (B*C, D, H, Wl) -> (B, C, D, H, Wl) is a contiguous (free) reshape.
    return out.reshape(B, C, max_disp, H, Wl)


def diff_volume_v2_ref(left_feature, right_feature, max_disp):
    """Pure-JAX reference (mirrors the PyTorch code)."""
    B, C, H, Wl = left_feature.shape
    Wr = right_feature.shape[3]
    d_range = jnp.arange(max_disp).reshape(1, 1, max_disp, 1, 1)
    x_index = jnp.arange(Wl).reshape(1, 1, 1, 1, Wl)
    idx = jnp.clip(4 * x_index - d_range + 1, 0, Wr - 1)
    idx = jnp.broadcast_to(idx, (B, C, max_disp, H, Wl))
    right5 = jnp.broadcast_to(
        right_feature[:, :, None].astype(left_feature.dtype),
        (B, C, max_disp, H, Wr))
    gathered = jnp.take_along_axis(right5, idx, axis=-1)
    return left_feature[:, :, None] - gathered


if __name__ == "__main__":
    key = jax.random.PRNGKey(0)
    k1, k2, k3, k4, k5, k6 = jax.random.split(key, 6)

    def check(left, right, max_disp, **kw):
        out = jax.block_until_ready(diff_volume_v2(left, right, max_disp, **kw))
        ref = diff_volume_v2_ref(left, right, max_disp)
        assert out.shape == ref.shape
        assert jnp.allclose(out, ref, atol=1e-6, rtol=1e-6), (
            "max abs err = %f" % float(jnp.max(jnp.abs(out - ref))))

    # 1) Single-chunk (fully static) path; right exactly 4x wider.
    check(jax.random.normal(k1, (2, 8, 8, 16), dtype=jnp.float32),
          jax.random.normal(k2, (2, 8, 8, 64), dtype=jnp.float32), 8)

    # 2) Right narrower than 4*Wl (upper clip active), odd B*C, odd max_disp.
    check(jax.random.normal(k3, (1, 3, 8, 16), dtype=jnp.float32),
          jax.random.normal(k4, (1, 3, 8, 57), dtype=jnp.float32), 11)

    # 3) Chunked-disparity path (dynamic slice start), grid = (2, 2).
    check(jax.random.normal(k5, (1, 4, 8, 32), dtype=jnp.float32),
          jax.random.normal(k6, (1, 4, 8, 128), dtype=jnp.float32), 16,
          block_ct=2, block_dt=8)

    # 4) bf16 stays bf16 end to end (no f32 promotion anywhere).
    check(jax.random.normal(k1, (2, 4, 8, 16), dtype=jnp.bfloat16),
          jax.random.normal(k2, (2, 4, 8, 64), dtype=jnp.bfloat16), 8)

    print("KERNEL_OK")
</pallas_src>

<mosaic_0001>
module attributes {stable_mosaic.version = 11 : i64} {
  func.func @_diff_volume_kernel(%arg0: i32, %arg1: i32, %arg2: memref<16x8x16xf32, #tpu.memory_space<vmem>>, %arg3: memref<16x4x8x18xf32, #tpu.memory_space<vmem>>, %arg4: memref<16x8x8x16xf32, #tpu.memory_space<vmem>>) attributes {dimension_semantics = [#tpu.dimension_semantics<parallel>, #tpu.dimension_semantics<parallel>], iteration_bounds = array<i64: 1, 1>, scalar_prefetch = 0 : i64, scratch_operands = 0 : i64, tpu.core_type = #tpu.core_type<tc>, window_params = [{transform_indices = @transform_0, window_bounds = array<i64: 16, 8, 16>}, {transform_indices = @transform_1, window_bounds = array<i64: 16, 4, 8, 18>}, {transform_indices = @transform_2, window_bounds = array<i64: 16, 8, 8, 16>}]} {
    %c0 = arith.constant 0 : index
    %c1 = arith.constant 1 : index
    %c0_0 = arith.constant 0 : index
    %c2 = arith.constant 2 : index
    %0 = vector.load %arg3[%c0, %c1, %c0_0, %c2] : memref<16x4x8x18xf32, #tpu.memory_space<vmem>>, vector<16x1x8x16xf32>
    %1 = vector.shape_cast %0 : vector<16x1x8x16xf32> to vector<16x8x16xf32>
    %c0_1 = arith.constant 0 : index
    %c0_2 = arith.constant 0 : index
    %c0_3 = arith.constant 0 : index
    %2 = vector.load %arg2[%c0_1, %c0_2, %c0_3] : memref<16x8x16xf32, #tpu.memory_space<vmem>>, vector<16x8x16xf32>
    %3 = arith.subf %2, %1 : vector<16x8x16xf32>
    %c0_4 = arith.constant 0 : index
    %c0_5 = arith.constant 0 : index
    %c0_6 = arith.constant 0 : index
    %c0_7 = arith.constant 0 : index
    %4 = vector.load %arg4[%c0_4, %c0_5, %c0_6, %c0_7] : memref<16x8x8x16xf32, #tpu.memory_space<vmem>>, vector<16x1x8x16xf32>
    %5 = vector.shape_cast %4 : vector<16x1x8x16xf32> to vector<16x8x16xf32>
    %6 = vector.shape_cast %3 : vector<16x8x16xf32> to vector<16x1x8x16xf32>
    tpu.vector_store %arg4[%c0_4, %c0_5, %c0_6, %c0_7], %6 {strides = array<i32>} : memref<16x8x8x16xf32, #tpu.memory_space<vmem>>, vector<16x1x8x16xf32>,
    %c0_8 = arith.constant 0 : index
    %c0_9 = arith.constant 0 : index
    %c0_10 = arith.constant 0 : index
    %c2_11 = arith.constant 2 : index
    %7 = vector.load %arg3[%c0_8, %c0_9, %c0_10, %c2_11] : memref<16x4x8x18xf32, #tpu.memory_space<vmem>>, vector<16x1x8x16xf32>
    %8 = vector.shape_cast %7 : vector<16x1x8x16xf32> to vector<16x8x16xf32>
    %c0_12 = arith.constant 0 : index
    %c0_13 = arith.constant 0 : index
    %c0_14 = arith.constant 0 : index
    %9 = vector.load %arg2[%c0_12, %c0_13, %c0_14] : memref<16x8x16xf32, #tpu.memory_space<vmem>>, vector<16x8x16xf32>
    %10 = arith.subf %9, %8 : vector<16x8x16xf32>
    %c0_15 = arith.constant 0 : index
    %c1_16 = arith.constant 1 : index
    %c0_17 = arith.constant 0 : index
    %c0_18 = arith.constant 0 : index
    %11 = vector.load %arg4[%c0_15, %c1_16, %c0_17, %c0_18] : memref<16x8x8x16xf32, #tpu.memory_space<vmem>>, vector<16x1x8x16xf32>
    %12 = vector.shape_cast %11 : vector<16x1x8x16xf32> to vector<16x8x16xf32>
    %13 = vector.shape_cast %10 : vector<16x8x16xf32> to vector<16x1x8x16xf32>
    tpu.vector_store %arg4[%c0_15, %c1_16, %c0_17, %c0_18], %13 {strides = array<i32>} : memref<16x8x8x16xf32, #tpu.memory_space<vmem>>, vector<16x1x8x16xf32>,
    %c0_19 = arith.constant 0 : index
    %c3 = arith.constant 3 : index
    %c0_20 = arith.constant 0 : index
    %c1_21 = arith.constant 1 : index
    %14 = vector.load %arg3[%c0_19, %c3, %c0_20, %c1_21] : memref<16x4x8x18xf32, #tpu.memory_space<vmem>>, vector<16x1x8x16xf32>
    %15 = vector.shape_cast %14 : vector<16x1x8x16xf32> to vector<16x8x16xf32>
    %c0_22 = arith.constant 0 : index
    %c0_23 = arith.constant 0 : index
    %c0_24 = arith.constant 0 : index
    %16 = vector.load %arg2[%c0_22, %c0_23, %c0_24] : memref<16x8x16xf32, #tpu.memory_space<vmem>>, vector<16x8x16xf32>
    %17 = arith.subf %16, %15 : vector<16x8x16xf32>
    %c0_25 = arith.constant 0 : index
    %c2_26 = arith.constant 2 : index
    %c0_27 = arith.constant 0 : index
    %c0_28 = arith.constant 0 : index
    %18 = vector.load %arg4[%c0_25, %c2_26, %c0_27, %c0_28] : memref<16x8x8x16xf32, #tpu.memory_space<vmem>>, vector<16x1x8x16xf32>
    %19 = vector.shape_cast %18 : vector<16x1x8x16xf32> to vector<16x8x16xf32>
    %20 = vector.shape_cast %17 : vector<16x8x16xf32> to vector<16x1x8x16xf32>
    tpu.vector_store %arg4[%c0_25, %c2_26, %c0_27, %c0_28], %20 {strides = array<i32>} : memref<16x8x8x16xf32, #tpu.memory_space<vmem>>, vector<16x1x8x16xf32>,
    %c0_29 = arith.constant 0 : index
    %c2_30 = arith.constant 2 : index
    %c0_31 = arith.constant 0 : index
    %c1_32 = arith.constant 1 : index
    %21 = vector.load %arg3[%c0_29, %c2_30, %c0_31, %c1_32] : memref<16x4x8x18xf32, #tpu.memory_space<vmem>>, vector<16x1x8x16xf32>
    %22 = vector.shape_cast %21 : vector<16x1x8x16xf32> to vector<16x8x16xf32>
    %c0_33 = arith.constant 0 : index
    %c0_34 = arith.constant 0 : index
    %c0_35 = arith.constant 0 : index
    %23 = vector.load %arg2[%c0_33, %c0_34, %c0_35] : memref<16x8x16xf32, #tpu.memory_space<vmem>>, vector<16x8x16xf32>
    %24 = arith.subf %23, %22 : vector<16x8x16xf32>
    %c0_36 = arith.constant 0 : index
    %c3_37 = arith.constant 3 : index
    %c0_38 = arith.constant 0 : index
    %c0_39 = arith.constant 0 : index
    %25 = vector.load %arg4[%c0_36, %c3_37, %c0_38, %c0_39] : memref<16x8x8x16xf32, #tpu.memory_space<vmem>>, vector<16x1x8x16xf32>
    %26 = vector.shape_cast %25 : vector<16x1x8x16xf32> to vector<16x8x16xf32>
    %27 = vector.shape_cast %24 : vector<16x8x16xf32> to vector<16x1x8x16xf32>
    tpu.vector_store %arg4[%c0_36, %c3_37, %c0_38, %c0_39], %27 {strides = array<i32>} : memref<16x8x8x16xf32, #tpu.memory_space<vmem>>, vector<16x1x8x16xf32>,
    %c0_40 = arith.constant 0 : index
    %c1_41 = arith.constant 1 : index
    %c0_42 = arith.constant 0 : index
    %c1_43 = arith.constant 1 : index
    %28 = vector.load %arg3[%c0_40, %c1_41, %c0_42, %c1_43] : memref<16x4x8x18xf32, #tpu.memory_space<vmem>>, vector<16x1x8x16xf32>
    %29 = vector.shape_cast %28 : vector<16x1x8x16xf32> to vector<16x8x16xf32>
    %c0_44 = arith.constant 0 : index
    %c0_45 = arith.constant 0 : index
    %c0_46 = arith.constant 0 : index
    %30 = vector.load %arg2[%c0_44, %c0_45, %c0_46] : memref<16x8x16xf32, #tpu.memory_space<vmem>>, vector<16x8x16xf32>
    %31 = arith.subf %30, %29 : vector<16x8x16xf32>
    %c0_47 = arith.constant 0 : index
    %c4 = arith.constant 4 : index
    %c0_48 = arith.constant 0 : index
    %c0_49 = arith.constant 0 : index
    %32 = vector.load %arg4[%c0_47, %c4, %c0_48, %c0_49] : memref<16x8x8x16xf32, #tpu.memory_space<vmem>>, vector<16x1x8x16xf32>
    %33 = vector.shape_cast %32 : vector<16x1x8x16xf32> to vector<16x8x16xf32>
    %34 = vector.shape_cast %31 : vector<16x8x16xf32> to vector<16x1x8x16xf32>
    tpu.vector_store %arg4[%c0_47, %c4, %c0_48, %c0_49], %34 {strides = array<i32>} : memref<16x8x8x16xf32, #tpu.memory_space<vmem>>, vector<16x1x8x16xf32>,
    %c0_50 = arith.constant 0 : index
    %c0_51 = arith.constant 0 : index
    %c0_52 = arith.constant 0 : index
    %c1_53 = arith.constant 1 : index
    %35 = vector.load %arg3[%c0_50, %c0_51, %c0_52, %c1_53] : memref<16x4x8x18xf32, #tpu.memory_space<vmem>>, vector<16x1x8x16xf32>
    %36 = vector.shape_cast %35 : vector<16x1x8x16xf32> to vector<16x8x16xf32>
    %c0_54 = arith.constant 0 : index
    %c0_55 = arith.constant 0 : index
    %c0_56 = arith.constant 0 : index
    %37 = vector.load %arg2[%c0_54, %c0_55, %c0_56] : memref<16x8x16xf32, #tpu.memory_space<vmem>>, vector<16x8x16xf32>
    %38 = arith.subf %37, %36 : vector<16x8x16xf32>
    %c0_57 = arith.constant 0 : index
    %c5 = arith.constant 5 : index
    %c0_58 = arith.constant 0 : index
    %c0_59 = arith.constant 0 : index
    %39 = vector.load %arg4[%c0_57, %c5, %c0_58, %c0_59] : memref<16x8x8x16xf32, #tpu.memory_space<vmem>>, vector<16x1x8x16xf32>
    %40 = vector.shape_cast %39 : vector<16x1x8x16xf32> to vector<16x8x16xf32>
    %41 = vector.shape_cast %38 : vector<16x8x16xf32> to vector<16x1x8x16xf32>
    tpu.vector_store %arg4[%c0_57, %c5, %c0_58, %c0_59], %41 {strides = array<i32>} : memref<16x8x8x16xf32, #tpu.memory_space<vmem>>, vector<16x1x8x16xf32>,
    %c0_60 = arith.constant 0 : index
    %c3_61 = arith.constant 3 : index
    %c0_62 = arith.constant 0 : index
    %c0_63 = arith.constant 0 : index
    %42 = vector.load %arg3[%c0_60, %c3_61, %c0_62, %c0_63] : memref<16x4x8x18xf32, #tpu.memory_space<vmem>>, vector<16x1x8x16xf32>
    %43 = vector.shape_cast %42 : vector<16x1x8x16xf32> to vector<16x8x16xf32>
    %c0_64 = arith.constant 0 : index
    %c0_65 = arith.constant 0 : index
    %c0_66 = arith.constant 0 : index
    %44 = vector.load %arg2[%c0_64, %c0_65, %c0_66] : memref<16x8x16xf32, #tpu.memory_space<vmem>>, vector<16x8x16xf32>
    %45 = arith.subf %44, %43 : vector<16x8x16xf32>
    %c0_67 = arith.constant 0 : index
    %c6 = arith.constant 6 : index
    %c0_68 = arith.constant 0 : index
    %c0_69 = arith.constant 0 : index
    %46 = vector.load %arg4[%c0_67, %c6, %c0_68, %c0_69] : memref<16x8x8x16xf32, #tpu.memory_space<vmem>>, vector<16x1x8x16xf32>
    %47 = vector.shape_cast %46 : vector<16x1x8x16xf32> to vector<16x8x16xf32>
    %48 = vector.shape_cast %45 : vector<16x8x16xf32> to vector<16x1x8x16xf32>
    tpu.vector_store %arg4[%c0_67, %c6, %c0_68, %c0_69], %48 {strides = array<i32>} : memref<16x8x8x16xf32, #tpu.memory_space<vmem>>, vector<16x1x8x16xf32>,
    %c0_70 = arith.constant 0 : index
    %c2_71 = arith.constant 2 : index
    %c0_72 = arith.constant 0 : index
    %c0_73 = arith.constant 0 : index
    %49 = vector.load %arg3[%c0_70, %c2_71, %c0_72, %c0_73] : memref<16x4x8x18xf32, #tpu.memory_space<vmem>>, vector<16x1x8x16xf32>
    %50 = vector.shape_cast %49 : vector<16x1x8x16xf32> to vector<16x8x16xf32>
    %c0_74 = arith.constant 0 : index
    %c0_75 = arith.constant 0 : index
    %c0_76 = arith.constant 0 : index
    %51 = vector.load %arg2[%c0_74, %c0_75, %c0_76] : memref<16x8x16xf32, #tpu.memory_space<vmem>>, vector<16x8x16xf32>
    %52 = arith.subf %51, %50 : vector<16x8x16xf32>
    %c0_77 = arith.constant 0 : index
    %c7 = arith.constant 7 : index
    %c0_78 = arith.constant 0 : index
    %c0_79 = arith.constant 0 : index
    %53 = vector.load %arg4[%c0_77, %c7, %c0_78, %c0_79] : memref<16x8x8x16xf32, #tpu.memory_space<vmem>>, vector<16x1x8x16xf32>
    %54 = vector.shape_cast %53 : vector<16x1x8x16xf32> to vector<16x8x16xf32>
    %55 = vector.shape_cast %52 : vector<16x8x16xf32> to vector<16x1x8x16xf32>
    tpu.vector_store %arg4[%c0_77, %c7, %c0_78, %c0_79], %55 {strides = array<i32>} : memref<16x8x8x16xf32, #tpu.memory_space<vmem>>, vector<16x1x8x16xf32>,
    return
  }
  func.func @transform_0(%arg0: i32, %arg1: i32) -> (i32, i32, i32) {
    %c0_i32 = arith.constant 0 : i32
    %c0_i32_0 = arith.constant 0 : i32
    %c0_i32_1 = arith.constant 0 : i32
    return %arg0, %c0_i32, %c0_i32_0 : i32, i32, i32
  }
  func.func @transform_1(%arg0: i32, %arg1: i32) -> (i32, i32, i32, i32) {
    %c0_i32 = arith.constant 0 : i32
    %c0_i32_0 = arith.constant 0 : i32
    %c0_i32_1 = arith.constant 0 : i32
    %c0_i32_2 = arith.constant 0 : i32
    return %arg0, %c0_i32, %c0_i32_0, %c0_i32_1 : i32, i32, i32, i32
  }
  func.func @transform_2(%arg0: i32, %arg1: i32) -> (i32, i32, i32, i32) {
    %c0_i32 = arith.constant 0 : i32
    %c0_i32_0 = arith.constant 0 : i32
    %c0_i32_1 = arith.constant 0 : i32
    return %arg0, %arg1, %c0_i32, %c0_i32_0 : i32, i32, i32, i32
  }
}

</mosaic_0001>

<bundles_post_ra>
// kernel: tpu_custom_call.1
= control target key start
LH: loop header
LB: loop body
LE: loop exit
PB: predicated region body
PF: predicated region fallthrough
CT: control target
= control target key end

     0   :  { %7 = vsyncpa [#allocation3], 0  ;;  %s1685_s0 = inlined_call_operand.hbm [shape: f32[16,8,16], index: 0, kind: input, shape index: {}]   ;;  %s1686_s1 = inlined_call_operand.hbm [shape: f32[16,4,8,18], index: 1, kind: input, shape index: {}]   ;;  %s1687_s2 = inlined_call_operand.hbm [shape: f32[16,8,8,16], index: 2, kind: output, shape index: {}]  }
   0x1   :  { %8 = vsyncpa [#allocation6], 0 }
   0x2   :  { %9 = vsyncpa [#allocation4], 0  ;;  %s1038_s9 = smov [#allocation2]  }
   0x3   :  { %s15_s10 = sshll.u32 %s1038_s9, 4  ;;  %s16_s10 = int_to_ptr.vmem [resolvable:$true] %s15_s10 }
   0x4   :  { %s980_s11 = scalar_lea.vmem %s16_s10, 2048  ;;  %p985_p1 = scmp.lt.s32.totalorder %s16_s10, %s16_s10 }
   0x5   :  { %p981_p0 = scmp.ne.s32.totalorder %s16_s10, %s980_s11  ;;  %p986_p2 = scmp.lt.s32.totalorder %s980_s11, %s980_s11 }
   0x7   :  { %p987_p3 = por %p986_p2, %p985_p1 }
   0x9   :  { %p988_p4 = pnand %p987_p3, %p981_p0 }
   0xb   :  { %991 = shalt.err (!%p988_p4)
}
   0xc   :  { %s1039_s12 = smov 128   ;;  %s1040_s13 = smov 8  }
   0xd   :  { %21 = dma.hbm_to_vmem [thread:$0]  %s1685_s0, 2048, %s16_s10, [#allocation3], %s1039_s12, %s1039_s12, %s1040_s13  }
   0xe   :  { %s1041_s16 = smov [#allocation5]  }
   0xf   :  { %s27_s17 = sshll.u32 %s1041_s16, 4  ;;  %s28_s17 = int_to_ptr.vmem [resolvable:$true] %s27_s17 }
  0x10   :  { %s1000_s18 = scalar_lea.vmem %s28_s17, 8192  ;;  %p1005_p6 = scmp.lt.s32.totalorder %s28_s17, %s28_s17 }
  0x11   :  { %p1001_p5 = scmp.ne.s32.totalorder %s28_s17, %s1000_s18  ;;  %p1006_p7 = scmp.lt.s32.totalorder %s1000_s18, %s1000_s18 }
  0x13   :  { %p1007_p8 = por %p1006_p7, %p1005_p6 }
  0x15   :  { %p1008_p9 = pnand %p1007_p8, %p1001_p5 }
  0x17   :  { %1011 = shalt.err (!%p1008_p9)
}
  0x18   :  { %33 = dma.hbm_to_vmem [thread:$0]  %s1686_s1, 8192, %s28_s17, [#allocation6], %s1039_s12, %s1039_s12, %s1040_s13  }
  0x19   :  { %1032 = dma.done.wait [#allocation3], 2048  }
  0x1a   :  { %1033 = vsyncadd [#allocation3], 4294965248 }
  0x1b   :  { %1034 = dma.done.wait [#allocation6], 8192  }
  0x1c   :  { %1035 = vsyncadd [#allocation6], 4294959104  ;;  %v1072_v0 = vld [vmem:[#allocation5 + $0x48] sm:$0xff]  ;;  %s1042_s0 = smov 126   ;;  %v1136_v16 = vld [vmem:[#allocation5 + $0x20] sm:$0xff]  ;;  %s1043_s1 = smov 127  }
  0x1d   :  { %v1074_v1 = vld [vmem:[#allocation5 + $0x8] sm:$0xff]  ;;  %93 = vrot.lane.b32.xlu1 %v1072_v0, %s1042_s0  ;;  %v1138_v17 = vld [vmem:[#allocation5] sm:$0xff]  ;;  %v301_v32 = vld [vmem:[#allocation5 + $0x38] sm:$0xff]  ;;  %vm153_vm0 = vcmask 130048   ;;  %s1044_s21 = smov [#allocation7]  }
  0x1e   :  { %89 = vrot.lane.b32.xlu0 %v1074_v1, %s1042_s0  ;;  %v1080_v2 = vld [vmem:[#allocation5 + $0x68] sm:$0xff]  ;;  %v1144_v18 = vld [vmem:[#allocation5 + $0x60] sm:$0xff]  ;;  %v1200_v33 = vld [vmem:[#allocation5 + $0x18] sm:$0xff]  ;;  %s952_s22 = sshll.u32 %s1044_s21, 4  ;;  %s953_s22 = int_to_ptr.vmem [resolvable:$true] %s952_s22 }
  0x1f   :  { %v1082_v3 = vld [vmem:[#allocation5 + $0x28] sm:$0xff]  ;;  %v1146_v19 = vld [vmem:[#allocation5 + $0x40] sm:$0xff]  ;;  %v1205_v34 = vld [vmem:[#allocation5 + $0x78] sm:$0xff]  ;;  %s1012_s23 = scalar_lea.vmem %s953_s22, 16384  ;;  %p1017_p11 = scmp.lt.s32.totalorder %s953_s22, %s953_s22 }
  0x20   :  { %v1088_v4 = vld [vmem:[#allocation5 + $0xa8] sm:$0xff]  ;;  %v1152_v20 = vld [vmem:[#allocation5 + $0xa0] sm:$0xff]  ;;  %v1207_v35 = vld [vmem:[#allocation5 + $0x58] sm:$0xff]  ;;  %p1013_p10 = scmp.ne.s32.totalorder %s953_s22, %s1012_s23  ;;  %p1018_p12 = scmp.lt.s32.totalorder %s1012_s23, %s1012_s23 }
  0x21   :  { %95 = vrot.lane.b32.xlu1 %v1080_v2, %s1042_s0  ;;  %v1090_v5 = vld [vmem:[#allocation5 + $0x88] sm:$0xff]  ;;  %v1154_v21 = vld [vmem:[#allocation5 + $0x80] sm:$0xff]  ;;  %v1213_v36 = vld [vmem:[#allocation5 + $0xb8] sm:$0xff] }
  0x22   :  { %91 = vrot.lane.b32.xlu0 %v1082_v3, %s1042_s0  ;;  %v1096_v6 = vld [vmem:[#allocation5 + $0xe8] sm:$0xff]  ;;  %v1160_v22 = vld [vmem:[#allocation5 + $0xe0] sm:$0xff]  ;;  %v1215_v37 = vld [vmem:[#allocation5 + $0x98] sm:$0xff]  ;;  %p1019_p13 = por %p1018_p12, %p1017_p11 }
  0x23   :  { %v1098_v7 = vld [vmem:[#allocation5 + $0xc8] sm:$0xff]  ;;  %v1162_v23 = vld [vmem:[#allocation5 + $0xc0] sm:$0xff]  ;;  %v1221_v38 = vld [vmem:[#allocation5 + $0xf8] sm:$0xff] }
  0x24   :  { %v1104_v8 = vld [vmem:[#allocation5 + $0x128] sm:$0xff]  ;;  %v1168_v24 = vld [vmem:[#allocation5 + $0x120] sm:$0xff]  ;;  %v1223_v39 = vld [vmem:[#allocation5 + $0xd8] sm:$0xff]  ;;  %p1020_p0 = pnand %p1019_p13, %p1013_p10 }
  0x25   :  { %99 = vrot.lane.b32.xlu1 %v1088_v4, %s1042_s0  ;;  %v1106_v9 = vld [vmem:[#allocation5 + $0x108] sm:$0xff]  ;;  %v1170_v25 = vld [vmem:[#allocation5 + $0x100] sm:$0xff]  ;;  %v1229_v40 = vld [vmem:[#allocation5 + $0x138] sm:$0xff] }
  0x26   :  { %97 = vrot.lane.b32.xlu0 %v1090_v5, %s1042_s0  ;;  %v1112_v10 = vld [vmem:[#allocation5 + $0x168] sm:$0xff]  ;;  %v1176_v26 = vld [vmem:[#allocation5 + $0x160] sm:$0xff]  ;;  %v1231_v41 = vld [vmem:[#allocation5 + $0x118] sm:$0xff] }
  0x27   :  { %v1114_v11 = vld [vmem:[#allocation5 + $0x148] sm:$0xff]  ;;  %v1178_v27 = vld [vmem:[#allocation5 + $0x140] sm:$0xff]  ;;  %v1237_v42 = vld [vmem:[#allocation5 + $0x178] sm:$0xff] }
  0x28   :  { %v1120_v12 = vld [vmem:[#allocation5 + $0x1a8] sm:$0xff]  ;;  %v1184_v28 = vld [vmem:[#allocation5 + $0x1a0] sm:$0xff]  ;;  %v1239_v43 = vld [vmem:[#allocation5 + $0x158] sm:$0xff] }
  0x29   :  { %103 = vrot.lane.b32.xlu1 %v1096_v6, %s1042_s0  ;;  %v1122_v13 = vld [vmem:[#allocation5 + $0x188] sm:$0xff]  ;;  %v1186_v29 = vld [vmem:[#allocation5 + $0x180] sm:$0xff]  ;;  %v1245_v44 = vld [vmem:[#allocation5 + $0x1b8] sm:$0xff] }
  0x2a   :  { %101 = vrot.lane.b32.xlu0 %v1098_v7, %s1042_s0  ;;  %v1128_v14 = vld [vmem:[#allocation5 + $0x1e8] sm:$0xff]  ;;  %v1192_v30 = vld [vmem:[#allocation5 + $0x1e0] sm:$0xff]  ;;  %v1247_v45 = vld [vmem:[#allocation5 + $0x198] sm:$0xff] }
  0x2b   :  { %v1130_v15 = vld [vmem:[#allocation5 + $0x1c8] sm:$0xff]  ;;  %v1194_v31 = vld [vmem:[#allocation5 + $0x1c0] sm:$0xff]  ;;  %v1253_v46 = vld [vmem:[#allocation5 + $0x1f8] sm:$0xff] }
  0x2c   :  { %1689 = vst [vmem:[#allocation11_spill] sm:$0xff] %v1194_v31  ;;  %v1255_v47 = vld [vmem:[#allocation5 + $0x1d8] sm:$0xff]  ;;  %v431_v48 = vld [vmem:[#allocation5 + $0x30] sm:$0xff]  ;;  %v1273_v59 = vld [vmem:[#allocation2] sm:$0xff] }
  0x2d   :  { %107 = vrot.lane.b32.xlu1 %v1104_v8, %s1042_s0  ;;  %v430_v49 = vld [vmem:[#allocation5 + $0x10] sm:$0xff] }
  0x2e   :  { %105 = vrot.lane.b32.xlu0 %v1106_v9, %s1042_s0  ;;  %v433_v50 = vld [vmem:[#allocation5 + $0x70] sm:$0xff] }
  0x2f   :  { %v432_v51 = vld [vmem:[#allocation5 + $0x50] sm:$0xff] }
  0x30   :  { %v435_v52 = vld [vmem:[#allocation5 + $0xb0] sm:$0xff] }
  0x31   :  { %111 = vrot.lane.b32.xlu1 %v1112_v10, %s1042_s0  ;;  %v434_v53 = vld [vmem:[#allocation5 + $0x90] sm:$0xff] }
  0x32   :  { %109 = vrot.lane.b32.xlu0 %v1114_v11, %s1042_s0  ;;  %v437_v54 = vld [vmem:[#allocation5 + $0xf0] sm:$0xff] }
  0x33   :  { %v436_v55 = vld [vmem:[#allocation5 + $0xd0] sm:$0xff] }
  0x34   :  { %v439_v56 = vld [vmem:[#allocation5 + $0x130] sm:$0xff] }
  0x35   :  { %115 = vrot.lane.b32.xlu1 %v1120_v12, %s1042_s0  ;;  %v438_v57 = vld [vmem:[#allocation5 + $0x110] sm:$0xff] }
  0x36   :  { %113 = vrot.lane.b32.xlu0 %v1122_v13, %s1042_s0  ;;  %v1271_v58 = vld [vmem:[#allocation2 + $0x10] sm:$0xff] }
  0x37   :  { %v441_v60 = vld [vmem:[#allocation5 + $0x170] sm:$0xff] }
  0x38   :  { %v440_v61 = vld [vmem:[#allocation5 + $0x150] sm:$0xff] }
  0x39   :  { %119 = vrot.lane.b32.xlu1 %v1128_v14, %s1042_s0 }
  0x3a   :  { %117 = vrot.lane.b32.xlu0 %v1130_v15, %s1042_s0 }
  0x3d   :  { %220 = vrot.lane.b32.xlu1 %v1136_v16, %s1042_s0 }
  0x3e   :  { %218 = vrot.lane.b32.xlu0 %v1138_v17, %s1042_s0 }
  0x41   :  { %224 = vrot.lane.b32.xlu1 %v1144_v18, %s1042_s0 }
  0x42   :  { %222 = vrot.lane.b32.xlu0 %v1146_v19, %s1042_s0 }
  0x45   :  { %228 = vrot.lane.b32.xlu1 %v1152_v20, %s1042_s0 }
  0x46   :  { %226 = vrot.lane.b32.xlu0 %v1154_v21, %s1042_s0 }
  0x49   :  { %232 = vrot.lane.b32.xlu1 %v1160_v22, %s1042_s0 }
  0x4a   :  { %230 = vrot.lane.b32.xlu0 %v1162_v23, %s1042_s0 }
  0x4d   :  { %236 = vrot.lane.b32.xlu1 %v1168_v24, %s1042_s0 }
  0x4e   :  { %234 = vrot.lane.b32.xlu0 %v1170_v25, %s1042_s0 }
  0x51   :  { %240 = vrot.lane.b32.xlu1 %v1176_v26, %s1042_s0 }
  0x52   :  { %238 = vrot.lane.b32.xlu0 %v1178_v27, %s1042_s0 }
  0x55   :  { %244 = vrot.lane.b32.xlu1 %v1184_v28, %s1042_s0 }
  0x56   :  { %242 = vrot.lane.b32.xlu0 %v1186_v29, %s1042_s0 }
  0x59   :  { %248 = vrot.lane.b32.xlu1 %v1192_v30, %s1042_s0 }
  0x5a   :  { %246 = vrot.lane.b32.xlu0 %v1194_v31, %s1042_s0  ;;  %v1319_v31 = vld [vmem:[#allocation2 + $0x40] sm:$0xff] }
  0x5d   :  { %350 = vrot.lane.b32.xlu1 %v301_v32, %s1043_s1 }
  0x5e   :  { %348 = vrot.lane.b32.xlu0 %v1200_v33, %s1043_s1 }
  0x61   :  { %354 = vrot.lane.b32.xlu1 %v1205_v34, %s1043_s1 }
  0x62   :  { %352 = vrot.lane.b32.xlu0 %v1207_v35, %s1043_s1 }
  0x65   :  { %358 = vrot.lane.b32.xlu1 %v1213_v36, %s1043_s1 }
  0x66   :  { %356 = vrot.lane.b32.xlu0 %v1215_v37, %s1043_s1 }
  0x69   :  { %362 = vrot.lane.b32.xlu1 %v1221_v38, %s1043_s1 }
  0x6a   :  { %360 = vrot.lane.b32.xlu0 %v1223_v39, %s1043_s1 }
  0x6d   :  { %366 = vrot.lane.b32.xlu1 %v1229_v40, %s1043_s1 }
  0x6e   :  { %364 = vrot.lane.b32.xlu0 %v1231_v41, %s1043_s1 }
  0x71   :  { %370 = vrot.lane.b32.xlu1 %v1237_v42, %s1043_s1 }
  0x72   :  { %368 = vrot.lane.b32.xlu0 %v1239_v43, %s1043_s1 }
  0x75   :  { %374 = vrot.lane.b32.xlu1 %v1245_v44, %s1043_s1 }
  0x76   :  { %372 = vrot.lane.b32.xlu0 %v1247_v45, %s1043_s1 }
  0x79   :  { %378 = vrot.lane.b32.xlu1 %v1253_v46, %s1043_s1 }
  0x7a   :  { %376 = vrot.lane.b32.xlu0 %v1255_v47, %s1043_s1 }
  0x7d   :  { %480 = vrot.lane.b32.xlu1 %v431_v48, %s1043_s1 }
  0x7e   :  { %478 = vrot.lane.b32.xlu0 %v430_v49, %s1043_s1  ;;  %v1279_v49 = vld [vmem:[#allocation2 + $0x18] sm:$0xff] }
  0x81   :  { %484 = vrot.lane.b32.xlu1 %v433_v50, %s1043_s1  ;;  %v1281_v50 = vld [vmem:[#allocation2 + $0x8] sm:$0xff] }
  0x82   :  { %482 = vrot.lane.b32.xlu0 %v432_v51, %s1043_s1  ;;  %v443_v51 = vld [vmem:[#allocation5 + $0x1b0] sm:$0xff] }
  0x85   :  { %488 = vrot.lane.b32.xlu1 %v435_v52, %s1043_s1  ;;  %v442_v52 = vld [vmem:[#allocation5 + $0x190] sm:$0xff] }
  0x86   :  { %486 = vrot.lane.b32.xlu0 %v434_v53, %s1043_s1 }
  0x89   :  { %492 = vrot.lane.b32.xlu1 %v437_v54, %s1043_s1 }
  0x8a   :  { %490 = vrot.lane.b32.xlu0 %v436_v55, %s1043_s1 }
  0x8d   :  { %496 = vrot.lane.b32.xlu1 %v439_v56, %s1043_s1 }
  0x8e   :  { %494 = vrot.lane.b32.xlu0 %v438_v57, %s1043_s1  ;;  %v1289_v57 = vld [vmem:[#allocation2 + $0x28] sm:$0xff] }
  0x8f   :  { %v94_v62 = vpop.permute.xlu1 %93 }
  0x90   :  { %v90_v63 = vpop.permute.xlu0 %89  ;;  %v139_v32 = vsub.f32 %v1271_v58, %v94_v62  ;;  %v1297_v62 = vld [vmem:[#allocation5 + $0x1d0] sm:$0xff] }
  0x91   :  { %v137_v48 = vsub.f32 %v1273_v59, %v90_v63  ;;  %500 = vrot.lane.b32.xlu1 %v441_v60, %s1043_s1  ;;  %v1291_v60 = vld [vmem:[#allocation2 + $0x20] sm:$0xff] }
  0x92   :  { %498 = vrot.lane.b32.xlu0 %v440_v61, %s1043_s1  ;;  %156 = vst.msk [vmem:[#allocation7 + $0x80] sm:$0xff] %vm153_vm0, %v139_v32  ;;  %v1295_v61 = vld [vmem:[#allocation5 + $0x1f0] sm:$0xff] }
  0x93   :  { %154 = vst.msk [vmem:[#allocation7] sm:$0xff] %vm153_vm0, %v137_v48  ;;  %v96_v53 = vpop.permute.xlu1 %95 }
  0x94   :  { %v92_v54 = vpop.permute.xlu0 %91  ;;  %v140_v55 = vsub.f32 %v1279_v49, %v96_v53  ;;  %v1307_v53 = vld [vmem:[#allocation2 + $0x30] sm:$0xff] }
  0x95   :  { %v138_v56 = vsub.f32 %v1281_v50, %v92_v54  ;;  %504 = vrot.lane.b32.xlu1 %v443_v51, %s1043_s1 }
  0x96   :  { %502 = vrot.lane.b32.xlu0 %v442_v52, %s1043_s1  ;;  %157 = vst.msk [vmem:[#allocation7 + $0xc0] sm:$0xff] %vm153_vm0, %v140_v55  ;;  %v1305_v52 = vld [vmem:[#allocation2 + $0x38] sm:$0xff] }
  0x97   :  { %155 = vst.msk [vmem:[#allocation7 + $0x40] sm:$0xff] %vm153_vm0, %v138_v56  ;;  %v100_v63 = vpop.permute.xlu1 %99 }
  0x98   :  { %v98_v32 = vpop.permute.xlu0 %97  ;;  %v142_v48 = vsub.f32 %v1289_v57, %v100_v63 }
  0x99   :  { %v141_v51 = vsub.f32 %v1291_v60, %v98_v32  ;;  %508 = vrot.lane.b32.xlu1 %v1295_v61, %s1043_s1  ;;  %v1317_v32 = vld [vmem:[#allocation2 + $0x48] sm:$0xff] }
  0x9a   :  { %506 = vrot.lane.b32.xlu0 %v1297_v62, %s1043_s1  ;;  %159 = vst.msk [vmem:[#allocation7 + $0x140] sm:$0xff] %vm153_vm0, %v142_v48 }
  0x9b   :  { %158 = vst.msk [vmem:[#allocation7 + $0x100] sm:$0xff] %vm153_vm0, %v141_v51  ;;  %v104_v54 = vpop.permute.xlu1 %103 }
  0x9c   :  { %v102_v55 = vpop.permute.xlu0 %101  ;;  %v144_v56 = vsub.f32 %v1305_v52, %v104_v54 }
  0x9d   :  { %v143_v63 = vsub.f32 %v1307_v53, %v102_v55  ;;  %609 = vrot.lane.b32.xlu1 %v1082_v3, %s1043_s1  ;;  %v1331_v3 = vld [vmem:[#allocation2 + $0x50] sm:$0xff] }
  0x9e   :  { %607 = vrot.lane.b32.xlu0 %v1074_v1, %s1043_s1  ;;  %161 = vst.msk [vmem:[#allocation7 + $0x1c0] sm:$0xff] %vm153_vm0, %v144_v56  ;;  %v1329_v1 = vld [vmem:[#allocation2 + $0x58] sm:$0xff] }
  0x9f   :  { %160 = vst.msk [vmem:[#allocation7 + $0x180] sm:$0xff] %vm153_vm0, %v143_v63  ;;  %v108_v48 = vpop.permute.xlu1 %107 }
  0xa0   :  { %v106_v51 = vpop.permute.xlu0 %105  ;;  %v146_v54 = vsub.f32 %v1317_v32, %v108_v48 }
  0xa1   :  { %v145_v55 = vsub.f32 %v1319_v31, %v106_v51  ;;  %613 = vrot.lane.b32.xlu1 %v1080_v2, %s1043_s1  ;;  %v1343_v2 = vld [vmem:[#allocation2 + $0x60] sm:$0xff] }
  0xa2   :  { %611 = vrot.lane.b32.xlu0 %v1072_v0, %s1043_s1  ;;  %163 = vst.msk [vmem:[#allocation7 + $0x240] sm:$0xff] %vm153_vm0, %v146_v54  ;;  %v1341_v0 = vld [vmem:[#allocation2 + $0x68] sm:$0xff] }
  0xa3   :  { %162 = vst.msk [vmem:[#allocation7 + $0x200] sm:$0xff] %vm153_vm0, %v145_v55  ;;  %v112_v56 = vpop.permute.xlu1 %111 }
  0xa4   :  { %v110_v63 = vpop.permute.xlu0 %109  ;;  %v148_v48 = vsub.f32 %v1329_v1, %v112_v56 }
  0xa5   :  { %v147_v51 = vsub.f32 %v1331_v3, %v110_v63  ;;  %617 = vrot.lane.b32.xlu1 %v1088_v4, %s1043_s1  ;;  %v1353_v4 = vld [vmem:[#allocation2 + $0x78] sm:$0xff] }
  0xa6   :  { %615 = vrot.lane.b32.xlu0 %v1090_v5, %s1043_s1  ;;  %165 = vst.msk [vmem:[#allocation7 + $0x2c0] sm:$0xff] %vm153_vm0, %v148_v48  ;;  %v1355_v5 = vld [vmem:[#allocation2 + $0x70] sm:$0xff] }
  0xa7   :  { %164 = vst.msk [vmem:[#allocation7 + $0x280] sm:$0xff] %vm153_vm0, %v147_v51  ;;  %v116_v54 = vpop.permute.xlu1 %115 }
  0xa8   :  { %v114_v55 = vpop.permute.xlu0 %113  ;;  %v150_v56 = vsub.f32 %v1341_v0, %v116_v54 }
  0xa9   :  { %v149_v63 = vsub.f32 %v1343_v2, %v114_v55  ;;  %621 = vrot.lane.b32.xlu1 %v1096_v6, %s1043_s1 }
  0xaa   :  { %619 = vrot.lane.b32.xlu0 %v1098_v7, %s1043_s1  ;;  %167 = vst.msk [vmem:[#allocation7 + $0x340] sm:$0xff] %vm153_vm0, %v150_v56 }
  0xab   :  { %166 = vst.msk [vmem:[#allocation7 + $0x300] sm:$0xff] %vm153_vm0, %v149_v63  ;;  %v120_v48 = vpop.permute.xlu1 %119 }
  0xac   :  { %v118_v51 = vpop.permute.xlu0 %117  ;;  %v152_v54 = vsub.f32 %v1353_v4, %v120_v48 }
  0xad   :  { %v151_v55 = vsub.f32 %v1355_v5, %v118_v51  ;;  %625 = vrot.lane.b32.xlu1 %v1104_v8, %s1043_s1 }
  0xae   :  { %623 = vrot.lane.b32.xlu0 %v1106_v9, %s1043_s1  ;;  %169 = vst.msk [vmem:[#allocation7 + $0x3c0] sm:$0xff] %vm153_vm0, %v152_v54 }
  0xaf   :  { %168 = vst.msk [vmem:[#allocation7 + $0x380] sm:$0xff] %vm153_vm0, %v151_v55  ;;  %v221_v6 = vpop.permute.xlu1 %220 }
  0xb0   :  { %v219_v7 = vpop.permute.xlu0 %218  ;;  %v267_v56 = vsub.f32 %v1281_v50, %v221_v6 }
  0xb1   :  { %v266_v63 = vsub.f32 %v1273_v59, %v219_v7  ;;  %629 = vrot.lane.b32.xlu1 %v1112_v10, %s1043_s1 }
  0xb2   :  { %627 = vrot.lane.b32.xlu0 %v1114_v11, %s1043_s1  ;;  %284 = vst.msk [vmem:[#allocation7 + $0x48] sm:$0xff] %vm153_vm0, %v267_v56 }
  0xb3   :  { %283 = vst.msk [vmem:[#allocation7 + $0x8] sm:$0xff] %vm153_vm0, %v266_v63  ;;  %v225_v8 = vpop.permute.xlu1 %224 }
  0xb4   :  { %v223_v9 = vpop.permute.xlu0 %222  ;;  %v269_v48 = vsub.f32 %v1279_v49, %v225_v8 }
  0xb5   :  { %v268_v51 = vsub.f32 %v1271_v58, %v223_v9  ;;  %633 = vrot.lane.b32.xlu1 %v1120_v12, %s1043_s1 }
  0xb6   :  { %631 = vrot.lane.b32.xlu0 %v1122_v13, %s1043_s1  ;;  %286 = vst.msk [vmem:[#allocation7 + $0xc8] sm:$0xff] %vm153_vm0, %v269_v48 }
  0xb7   :  { %285 = vst.msk [vmem:[#allocation7 + $0x88] sm:$0xff] %vm153_vm0, %v268_v51  ;;  %v229_v10 = vpop.permute.xlu1 %228 }
  0xb8   :  { %v227_v11 = vpop.permute.xlu0 %226  ;;  %v271_v54 = vsub.f32 %v1289_v57, %v229_v10  ;;  %v818_v10 = vld [vmem:[#allocation5 + $0x38] sm:$0xff] }
  0xb9   :  { %v270_v55 = vsub.f32 %v1291_v60, %v227_v11  ;;  %637 = vrot.lane.b32.xlu1 %v1128_v14, %s1043_s1 }
  0xba   :  { %635 = vrot.lane.b32.xlu0 %v1130_v15, %s1043_s1  ;;  %288 = vst.msk [vmem:[#allocation7 + $0x148] sm:$0xff] %vm153_vm0, %v271_v54 }
  0xbb   :  { %287 = vst.msk [vmem:[#allocation7 + $0x108] sm:$0xff] %vm153_vm0, %v270_v55  ;;  %v233_v12 = vpop.permute.xlu1 %232  ;;  %v849_v55 = vsub.f32 %v1273_v59, %v1200_v33  ;;  %v853_v33 = vsub.f32 %v1291_v60, %v1215_v37  ;;  %v1462_v37 = vld [vmem:[#allocation5 + $0xd0] sm:$0xff] }
  0xbc   :  { %v231_v13 = vpop.permute.xlu0 %230  ;;  %v273_v6 = vsub.f32 %v1305_v52, %v233_v12  ;;  %v850_v12 = vsub.f32 %v1281_v50, %v818_v10  ;;  %v903_v10 = vld [vmem:[#allocation2 + $0x28] sm:$0xff] }
  0xbd   :  { %v272_v7 = vsub.f32 %v1307_v53, %v231_v13  ;;  %738 = vrot.lane.b32.xlu1 %v1136_v16, %s1043_s1  ;;  %v1430_v13 = vld [vmem:[#allocation5 + $0x30] sm:$0xff]  ;;  %866 = vst.msk [vmem:[#allocation7 + $0x30] sm:$0xff] %vm153_vm0, %v849_v55  ;;  %870 = vst.msk [vmem:[#allocation7 + $0x130] sm:$0xff] %vm153_vm0, %v853_v33 }
  0xbe   :  { %736 = vrot.lane.b32.xlu0 %v1138_v17, %s1043_s1  ;;  %290 = vst.msk [vmem:[#allocation7 + $0x1c8] sm:$0xff] %vm153_vm0, %v273_v6  ;;  %v852_v6 = vsub.f32 %v1279_v49, %v1205_v34  ;;  %v856_v34 = vsub.f32 %v1305_v52, %v1221_v38  ;;  %867 = vst.msk [vmem:[#allocation7 + $0x70] sm:$0xff] %vm153_vm0, %v850_v12  ;;  %v859_v38 = vsub.f32 %v1331_v3, %v1239_v43 }
  0xbf   :  { %289 = vst.msk [vmem:[#allocation7 + $0x188] sm:$0xff] %vm153_vm0, %v272_v7  ;;  %v237_v14 = vpop.permute.xlu1 %236  ;;  %v1442_v7 = vld [vmem:[#allocation5 + $0x50] sm:$0xff] }
  0xc0   :  { %v235_v15 = vpop.permute.xlu0 %234  ;;  %v275_v56 = vsub.f32 %v1317_v32, %v237_v14  ;;  %v1444_v14 = vld [vmem:[#allocation5 + $0x70] sm:$0xff]  ;;  %869 = vst.msk [vmem:[#allocation7 + $0xf0] sm:$0xff] %vm153_vm0, %v852_v6  ;;  %873 = vst.msk [vmem:[#allocation7 + $0x1f0] sm:$0xff] %vm153_vm0, %v856_v34  ;;  %v920_v6 = vsub.f32 %v1307_v53, %v1462_v37  ;;  %v928_v37 = vsub.f32 %v1355_v5, %v1297_v62 }
  0xc1   :  { %v274_v63 = vsub.f32 %v1319_v31, %v235_v15  ;;  %742 = vrot.lane.b32.xlu1 %v1144_v18, %s1043_s1  ;;  %v1446_v15 = vld [vmem:[#allocation5 + $0x90] sm:$0xff]  ;;  %876 = vst.msk [vmem:[#allocation7 + $0x2b0] sm:$0xff] %vm153_vm0, %v859_v38 }
  0xc2   :  { %740 = vrot.lane.b32.xlu0 %v1146_v19, %s1043_s1  ;;  %292 = vst.msk [vmem:[#allocation7 + $0x248] sm:$0xff] %vm153_vm0, %v275_v56  ;;  %v1448_v56 = vld [vmem:[#allocation5 + $0xb0] sm:$0xff]  ;;  %937 = vst.msk [vmem:[#allocation7 + $0x1b8] sm:$0xff] %vm153_vm0, %v920_v6 }
  0xc3   :  { %291 = vst.msk [vmem:[#allocation7 + $0x208] sm:$0xff] %vm153_vm0, %v274_v63  ;;  %v241_v16 = vpop.permute.xlu1 %240  ;;  %v1464_v63 = vld [vmem:[#allocation5 + $0xf0] sm:$0xff]  ;;  %945 = vst.msk [vmem:[#allocation7 + $0x3b8] sm:$0xff] %vm153_vm0, %v928_v37 }
  0xc4   :  { %v239_v17 = vpop.permute.xlu0 %238  ;;  %v277_v8 = vsub.f32 %v1329_v1, %v241_v16  ;;  %v1466_v16 = vld [vmem:[#allocation5 + $0x110] sm:$0xff]  ;;  %v921_v33 = vsub.f32 %v1305_v52, %v1464_v63 }
  0xc5   :  { %v276_v9 = vsub.f32 %v1331_v3, %v239_v17  ;;  %746 = vrot.lane.b32.xlu1 %v1152_v20, %s1043_s1 }
  0xc6   :  { %744 = vrot.lane.b32.xlu0 %v1154_v21, %s1043_s1  ;;  %294 = vst.msk [vmem:[#allocation7 + $0x2c8] sm:$0xff] %vm153_vm0, %v277_v8  ;;  %v861_v8 = vsub.f32 %v1343_v2, %v1247_v45  ;;  %v863_v45 = vsub.f32 %v1355_v5, %v1255_v47  ;;  %v901_v47 = vld [vmem:[#allocation2 + $0x18] sm:$0xff]  ;;  %938 = vst.msk [vmem:[#allocation7 + $0x1f8] sm:$0xff] %vm153_vm0, %v921_v33 }
  0xc7   :  { %293 = vst.msk [vmem:[#allocation7 + $0x288] sm:$0xff] %vm153_vm0, %v276_v9  ;;  %v245_v18 = vpop.permute.xlu1 %244  ;;  %v891_v9 = vld [vmem:[#allocation5 + $0x130] sm:$0xff]  ;;  %v917_v55 = vsub.f32 %v901_v47, %v1444_v14 }
  0xc8   :  { %v243_v19 = vpop.permute.xlu0 %242  ;;  %v279_v48 = vsub.f32 %v1341_v0, %v245_v18  ;;  %v1479_v18 = vld [vmem:[#allocation5 + $0x150] sm:$0xff]  ;;  %878 = vst.msk [vmem:[#allocation7 + $0x330] sm:$0xff] %vm153_vm0, %v861_v8  ;;  %880 = vst.msk [vmem:[#allocation7 + $0x3b0] sm:$0xff] %vm153_vm0, %v863_v45 }
  0xc9   :  { %v278_v51 = vsub.f32 %v1343_v2, %v243_v19  ;;  %750 = vrot.lane.b32.xlu1 %v1160_v22, %s1043_s1  ;;  %v1428_v22 = vld [vmem:[#allocation5 + $0x10] sm:$0xff]  ;;  %934 = vst.msk [vmem:[#allocation7 + $0xf8] sm:$0xff] %vm153_vm0, %v917_v55 }
  0xca   :  { %748 = vrot.lane.b32.xlu0 %v1162_v23, %s1043_s1  ;;  %296 = vst.msk [vmem:[#allocation7 + $0x348] sm:$0xff] %vm153_vm0, %v279_v48  ;;  %v851_v23 = vsub.f32 %v1271_v58, %v1207_v35  ;;  %v857_v35 = vsub.f32 %v1319_v31, %v1231_v41  ;;  %v860_v41 = vsub.f32 %v1329_v1, %v1237_v42  ;;  %v1481_v19 = vld [vmem:[#allocation5 + $0x170] sm:$0xff]  ;;  %v898_v48 = vld [vmem:[#allocation2] sm:$0xff] }
  0xcb   :  { %295 = vst.msk [vmem:[#allocation7 + $0x308] sm:$0xff] %vm153_vm0, %v278_v51  ;;  %v249_v20 = vpop.permute.xlu1 %248  ;;  %v862_v42 = vsub.f32 %v1341_v0, %v1245_v44  ;;  %v899_v51 = vld [vmem:[#allocation2 + $0x8] sm:$0xff]  ;;  %v864_v44 = vsub.f32 %v1353_v4, %v1253_v46  ;;  %v895_v46 = vld [vmem:[#allocation5 + $0x1b0] sm:$0xff] }
  0xcc   :  { %v247_v21 = vpop.permute.xlu0 %246  ;;  %v281_v11 = vsub.f32 %v1353_v4, %v249_v20  ;;  %868 = vst.msk [vmem:[#allocation7 + $0xb0] sm:$0xff] %vm153_vm0, %v851_v23  ;;  %874 = vst.msk [vmem:[#allocation7 + $0x230] sm:$0xff] %vm153_vm0, %v857_v35  ;;  %v900_v20 = vld [vmem:[#allocation2 + $0x10] sm:$0xff]  ;;  %v927_v35 = vsub.f32 %v1341_v0, %v895_v46 }
  0xcd   :  { %v280_v54 = vsub.f32 %v1355_v5, %v247_v21  ;;  %754 = vrot.lane.b32.xlu1 %v1168_v24, %s1043_s1  ;;  %v854_v24 = vsub.f32 %v1289_v57, %v1213_v36  ;;  %877 = vst.msk [vmem:[#allocation7 + $0x2f0] sm:$0xff] %vm153_vm0, %v860_v41  ;;  %v902_v21 = vld [vmem:[#allocation2 + $0x20] sm:$0xff]  ;;  %879 = vst.msk [vmem:[#allocation7 + $0x370] sm:$0xff] %vm153_vm0, %v862_v42 }
  0xce   :  { %752 = vrot.lane.b32.xlu0 %v1170_v25, %s1043_s1  ;;  %298 = vst.msk [vmem:[#allocation7 + $0x3c8] sm:$0xff] %vm153_vm0, %v281_v11  ;;  %v855_v25 = vsub.f32 %v1307_v53, %v1223_v39  ;;  %v858_v39 = vsub.f32 %v1317_v32, %v1229_v40  ;;  %v914_v11 = vsub.f32 %v898_v48, %v1428_v22  ;;  %881 = vst.msk [vmem:[#allocation7 + $0x3f0] sm:$0xff] %vm153_vm0, %v864_v44 }
  0xcf   :  { %297 = vst.msk [vmem:[#allocation7 + $0x388] sm:$0xff] %vm153_vm0, %v280_v54  ;;  %v351_v36 = vpop.permute.xlu1 %350  ;;  %871 = vst.msk [vmem:[#allocation7 + $0x170] sm:$0xff] %vm153_vm0, %v854_v24  ;;  %v916_v54 = vsub.f32 %v900_v20, %v1442_v7  ;;  %v918_v12 = vsub.f32 %v902_v21, %v1446_v15  ;;  %v919_v22 = vsub.f32 %v903_v10, %v1448_v56 }
  0xd0   :  { %v349_v17 = vpop.permute.xlu0 %348  ;;  %v397_v40 = vsub.f32 %v1281_v50, %v351_v36  ;;  %872 = vst.msk [vmem:[#allocation7 + $0x1b0] sm:$0xff] %vm153_vm0, %v855_v25  ;;  %875 = vst.msk [vmem:[#allocation7 + $0x270] sm:$0xff] %vm153_vm0, %v858_v39  ;;  %v922_v24 = vsub.f32 %v1319_v31, %v1466_v16  ;;  %v923_v7 = vsub.f32 %v1317_v32, %v891_v9 }
  0xd1   :  { %v396_v43 = vsub.f32 %v1273_v59, %v349_v17  ;;  %758 = vrot.lane.b32.xlu1 %v1176_v26, %s1043_s1  ;;  %v915_v26 = vsub.f32 %v899_v51, %v1430_v13  ;;  %931 = vst.msk [vmem:[#allocation7 + $0x38] sm:$0xff] %vm153_vm0, %v914_v11  ;;  %v924_v56 = vsub.f32 %v1331_v3, %v1479_v18  ;;  %933 = vst.msk [vmem:[#allocation7 + $0xb8] sm:$0xff] %vm153_vm0, %v916_v54 }
  0xd2   :  { %756 = vrot.lane.b32.xlu0 %v1178_v27, %s1043_s1  ;;  %414 = vst.msk [vmem:[#allocation7 + $0x50] sm:$0xff] %vm153_vm0, %v397_v40  ;;  %v894_v27 = vld [vmem:[#allocation5 + $0x190] sm:$0xff]  ;;  %v925_v25 = vsub.f32 %v1329_v1, %v1481_v19  ;;  %935 = vst.msk [vmem:[#allocation7 + $0x138] sm:$0xff] %vm153_vm0, %v918_v12 }
  0xd3   :  { %413 = vst.msk [vmem:[#allocation7 + $0x10] sm:$0xff] %vm153_vm0, %v396_v43  ;;  %v355_v23 = vpop.permute.xlu1 %354  ;;  %932 = vst.msk [vmem:[#allocation7 + $0x78] sm:$0xff] %vm153_vm0, %v915_v26  ;;  %v926_v34 = vsub.f32 %v1343_v2, %v894_v27 }
  0xd4   :  { %v353_v13 = vpop.permute.xlu0 %352  ;;  %v399_v14 = vsub.f32 %v1279_v49, %v355_v23  ;;  %936 = vst.msk [vmem:[#allocation7 + $0x178] sm:$0xff] %vm153_vm0, %v919_v22  ;;  %939 = vst.msk [vmem:[#allocation7 + $0x238] sm:$0xff] %vm153_vm0, %v922_v24 }
  0xd5   :  { %v398_v15 = vsub.f32 %v1271_v58, %v353_v13  ;;  %762 = vrot.lane.b32.xlu1 %v1184_v28, %s1043_s1  ;;  %940 = vst.msk [vmem:[#allocation7 + $0x278] sm:$0xff] %vm153_vm0, %v923_v7  ;;  %v929_v28 = vsub.f32 %v1353_v4, %v1295_v61  ;;  %941 = vst.msk [vmem:[#allocation7 + $0x2b8] sm:$0xff] %vm153_vm0, %v924_v56  ;;  %v1690_v61 = vld [vmem:[#allocation11_spill] sm:$0xff] }
  0xd6   :  { %760 = vrot.lane.b32.xlu0 %v1186_v29, %s1043_s1  ;;  %416 = vst.msk [vmem:[#allocation7 + $0xd0] sm:$0xff] %vm153_vm0, %v399_v14  ;;  %942 = vst.msk [vmem:[#allocation7 + $0x2f8] sm:$0xff] %vm153_vm0, %v925_v25 }
  0xd7   :  { %415 = vst.msk [vmem:[#allocation7 + $0x90] sm:$0xff] %vm153_vm0, %v398_v15  ;;  %v359_v29 = vpop.permute.xlu1 %358  ;;  %943 = vst.msk [vmem:[#allocation7 + $0x338] sm:$0xff] %vm153_vm0, %v926_v34 }
  0xd8   :  { %v357_v62 = vpop.permute.xlu0 %356  ;;  %944 = vst.msk [vmem:[#allocation7 + $0x378] sm:$0xff] %vm153_vm0, %v927_v35  ;;  %v401_v63 = vsub.f32 %v1289_v57, %v359_v29  ;;  %946 = vst.msk [vmem:[#allocation7 + $0x3f8] sm:$0xff] %vm153_vm0, %v929_v28 }
  0xd9   :  { %v400_v16 = vsub.f32 %v1291_v60, %v357_v62  ;;  %766 = vrot.lane.b32.xlu1 %v1192_v30, %s1043_s1 }
  0xda   :  { %764 = vrot.lane.b32.xlu0 %v1690_v61, %s1043_s1  ;;  %418 = vst.msk [vmem:[#allocation7 + $0x150] sm:$0xff] %vm153_vm0, %v401_v63 }
  0xdb   :  { %417 = vst.msk [vmem:[#allocation7 + $0x110] sm:$0xff] %vm153_vm0, %v400_v16  ;;  %v363_v36 = vpop.permute.xlu1 %362 }
  0xdc   :  { %v361_v17 = vpop.permute.xlu0 %360  ;;  %v403_v39 = vsub.f32 %v1305_v52, %v363_v36 }
  0xdd   :  { %v402_v38 = vsub.f32 %v1307_v53, %v361_v17 }
  0xde   :  { %420 = vst.msk [vmem:[#allocation7 + $0x1d0] sm:$0xff] %vm153_vm0, %v403_v39 }
  0xdf   :  { %419 = vst.msk [vmem:[#allocation7 + $0x190] sm:$0xff] %vm153_vm0, %v402_v38  ;;  %v367_v41 = vpop.permute.xlu1 %366 }
  0xe0   :  { %v365_v8 = vpop.permute.xlu0 %364  ;;  %v405_v30 = vsub.f32 %v1317_v32, %v367_v41 }
  0xe1   :  { %v404_v9 = vsub.f32 %v1319_v31, %v365_v8 }
  0xe2   :  { %422 = vst.msk [vmem:[#allocation7 + $0x250] sm:$0xff] %vm153_vm0, %v405_v30 }
  0xe3   :  { %421 = vst.msk [vmem:[#allocation7 + $0x210] sm:$0xff] %vm153_vm0, %v404_v9  ;;  %v371_v18 = vpop.permute.xlu1 %370 }
  0xe4   :  { %v369_v19 = vpop.permute.xlu0 %368  ;;  %v407_v40 = vsub.f32 %v1329_v1, %v371_v18 }
  0xe5   :  { %v406_v43 = vsub.f32 %v1331_v3, %v369_v19 }
  0xe6   :  { %424 = vst.msk [vmem:[#allocation7 + $0x2d0] sm:$0xff] %vm153_vm0, %v407_v40 }
  0xe7   :  { %423 = vst.msk [vmem:[#allocation7 + $0x290] sm:$0xff] %vm153_vm0, %v406_v43  ;;  %v375_v42 = vpop.permute.xlu1 %374 }
  0xe8   :  { %v373_v45 = vpop.permute.xlu0 %372  ;;  %v409_v48 = vsub.f32 %v1341_v0, %v375_v42 }
  0xe9   :  { %v408_v51 = vsub.f32 %v1343_v2, %v373_v45 }
  0xea   :  { %426 = vst.msk [vmem:[#allocation7 + $0x350] sm:$0xff] %vm153_vm0, %v409_v48 }
  0xeb   :  { %425 = vst.msk [vmem:[#allocation7 + $0x310] sm:$0xff] %vm153_vm0, %v408_v51  ;;  %v379_v20 = vpop.permute.xlu1 %378 }
  0xec   :  { %v377_v44 = vpop.permute.xlu0 %376  ;;  %v411_v47 = vsub.f32 %v1353_v4, %v379_v20 }
  0xed   :  { %v410_v21 = vsub.f32 %v1355_v5, %v377_v44 }
  0xee   :  { %428 = vst.msk [vmem:[#allocation7 + $0x3d0] sm:$0xff] %vm153_vm0, %v411_v47 }
  0xef   :  { %427 = vst.msk [vmem:[#allocation7 + $0x390] sm:$0xff] %vm153_vm0, %v410_v21  ;;  %v481_v10 = vpop.permute.xlu1 %480 }
  0xf0   :  { %v479_v11 = vpop.permute.xlu0 %478  ;;  %v527_v26 = vsub.f32 %v1281_v50, %v481_v10 }
  0xf1   :  { %v526_v27 = vsub.f32 %v1273_v59, %v479_v11 }
  0xf2   :  { %544 = vst.msk [vmem:[#allocation7 + $0x58] sm:$0xff] %vm153_vm0, %v527_v26 }
  0xf3   :  { %543 = vst.msk [vmem:[#allocation7 + $0x18] sm:$0xff] %vm153_vm0, %v526_v27  ;;  %v485_v46 = vpop.permute.xlu1 %484 }
  0xf4   :  { %v483_v54 = vpop.permute.xlu0 %482  ;;  %v529_v55 = vsub.f32 %v1279_v49, %v485_v46 }
  0xf5   :  { %v528_v12 = vsub.f32 %v1271_v58, %v483_v54 }
  0xf6   :  { %546 = vst.msk [vmem:[#allocation7 + $0xd8] sm:$0xff] %vm153_vm0, %v529_v55 }
  0xf7   :  { %545 = vst.msk [vmem:[#allocation7 + $0x98] sm:$0xff] %vm153_vm0, %v528_v12  ;;  %v489_v22 = vpop.permute.xlu1 %488 }
  0xf8   :  { %v487_v23 = vpop.permute.xlu0 %486  ;;  %v531_v13 = vsub.f32 %v1289_v57, %v489_v22 }
  0xf9   :  { %v530_v6 = vsub.f32 %v1291_v60, %v487_v23 }
  0xfa   :  { %548 = vst.msk [vmem:[#allocation7 + $0x158] sm:$0xff] %vm153_vm0, %v531_v13 }
  0xfb   :  { %547 = vst.msk [vmem:[#allocation7 + $0x118] sm:$0xff] %vm153_vm0, %v530_v6  ;;  %v493_v33 = vpop.permute.xlu1 %492 }
  0xfc   :  { %v491_v24 = vpop.permute.xlu0 %490  ;;  %v533_v7 = vsub.f32 %v1305_v52, %v493_v33 }
  0xfd   :  { %v532_v14 = vsub.f32 %v1307_v53, %v491_v24 }
  0xfe   :  { %550 = vst.msk [vmem:[#allocation7 + $0x1d8] sm:$0xff] %vm153_vm0, %v533_v7 }
  0xff   :  { %549 = vst.msk [vmem:[#allocation7 + $0x198] sm:$0xff] %vm153_vm0, %v532_v14  ;;  %v497_v15 = vpop.permute.xlu1 %496 }
 0x100   :  { %v495_v56 = vpop.permute.xlu0 %494  ;;  %v535_v25 = vsub.f32 %v1317_v32, %v497_v15 }
 0x101   :  { %v534_v34 = vsub.f32 %v1319_v31, %v495_v56 }
 0x102   :  { %552 = vst.msk [vmem:[#allocation7 + $0x258] sm:$0xff] %vm153_vm0, %v535_v25 }
 0x103   :  { %551 = vst.msk [vmem:[#allocation7 + $0x218] sm:$0xff] %vm153_vm0, %v534_v34  ;;  %v501_v35 = vpop.permute.xlu1 %500 }
 0x104   :  { %v499_v37 = vpop.permute.xlu0 %498  ;;  %v537_v28 = vsub.f32 %v1329_v1, %v501_v35 }
 0x105   :  { %v536_v29 = vsub.f32 %v1331_v3, %v499_v37 }
 0x106   :  { %554 = vst.msk [vmem:[#allocation7 + $0x2d8] sm:$0xff] %vm153_vm0, %v537_v28 }
 0x107   :  { %553 = vst.msk [vmem:[#allocation7 + $0x298] sm:$0xff] %vm153_vm0, %v536_v29  ;;  %v505_v62 = vpop.permute.xlu1 %504 }
 0x108   :  { %v503_v63 = vpop.permute.xlu0 %502  ;;  %v539_v16 = vsub.f32 %v1341_v0, %v505_v62 }
 0x109   :  { %v538_v61 = vsub.f32 %v1343_v2, %v503_v63 }
 0x10a   :  { %556 = vst.msk [vmem:[#allocation7 + $0x358] sm:$0xff] %vm153_vm0, %v539_v16 }
 0x10b   :  { %555 = vst.msk [vmem:[#allocation7 + $0x318] sm:$0xff] %vm153_vm0, %v538_v61  ;;  %v509_v36 = vpop.permute.xlu1 %508 }
 0x10c   :  { %v507_v17 = vpop.permute.xlu0 %506  ;;  %v541_v39 = vsub.f32 %v1353_v4, %v509_v36 }
 0x10d   :  { %v540_v38 = vsub.f32 %v1355_v5, %v507_v17 }
 0x10e   :  { %558 = vst.msk [vmem:[#allocation7 + $0x3d8] sm:$0xff] %vm153_vm0, %v541_v39 }
 0x10f   :  { %557 = vst.msk [vmem:[#allocation7 + $0x398] sm:$0xff] %vm153_vm0, %v540_v38  ;;  %v610_v41 = vpop.permute.xlu1 %609 }
 0x110   :  { %v608_v8 = vpop.permute.xlu0 %607  ;;  %v656_v30 = vsub.f32 %v1281_v50, %v610_v41 }
 0x111   :  { %v655_v9 = vsub.f32 %v1273_v59, %v608_v8 }
 0x112   :  { %673 = vst.msk [vmem:[#allocation7 + $0x60] sm:$0xff] %vm153_vm0, %v656_v30 }
 0x113   :  { %672 = vst.msk [vmem:[#allocation7 + $0x20] sm:$0xff] %vm153_vm0, %v655_v9  ;;  %v614_v18 = vpop.permute.xlu1 %613 }
 0x114   :  { %v612_v19 = vpop.permute.xlu0 %611  ;;  %v658_v40 = vsub.f32 %v1279_v49, %v614_v18 }
 0x115   :  { %v657_v43 = vsub.f32 %v1271_v58, %v612_v19 }
 0x116   :  { %675 = vst.msk [vmem:[#allocation7 + $0xe0] sm:$0xff] %vm153_vm0, %v658_v40 }
 0x117   :  { %674 = vst.msk [vmem:[#allocation7 + $0xa0] sm:$0xff] %vm153_vm0, %v657_v43  ;;  %v618_v42 = vpop.permute.xlu1 %617 }
 0x118   :  { %v616_v45 = vpop.permute.xlu0 %615  ;;  %v660_v48 = vsub.f32 %v1289_v57, %v618_v42 }
 0x119   :  { %v659_v51 = vsub.f32 %v1291_v60, %v616_v45 }
 0x11a   :  { %677 = vst.msk [vmem:[#allocation7 + $0x160] sm:$0xff] %vm153_vm0, %v660_v48 }
 0x11b   :  { %676 = vst.msk [vmem:[#allocation7 + $0x120] sm:$0xff] %vm153_vm0, %v659_v51  ;;  %v622_v20 = vpop.permute.xlu1 %621 }
 0x11c   :  { %v620_v44 = vpop.permute.xlu0 %619  ;;  %v662_v47 = vsub.f32 %v1305_v52, %v622_v20 }
 0x11d   :  { %v661_v21 = vsub.f32 %v1307_v53, %v620_v44 }
 0x11e   :  { %679 = vst.msk [vmem:[#allocation7 + $0x1e0] sm:$0xff] %vm153_vm0, %v662_v47 }
 0x11f   :  { %678 = vst.msk [vmem:[#allocation7 + $0x1a0] sm:$0xff] %vm153_vm0, %v661_v21  ;;  %v626_v10 = vpop.permute.xlu1 %625 }
 0x120   :  { %v624_v11 = vpop.permute.xlu0 %623  ;;  %v664_v26 = vsub.f32 %v1317_v32, %v626_v10 }
 0x121   :  { %v663_v27 = vsub.f32 %v1319_v31, %v624_v11 }
 0x122   :  { %681 = vst.msk [vmem:[#allocation7 + $0x260] sm:$0xff] %vm153_vm0, %v664_v26 }
 0x123   :  { %680 = vst.msk [vmem:[#allocation7 + $0x220] sm:$0xff] %vm153_vm0, %v663_v27  ;;  %v630_v46 = vpop.permute.xlu1 %629 }
 0x124   :  { %v628_v54 = vpop.permute.xlu0 %627  ;;  %v666_v55 = vsub.f32 %v1329_v1, %v630_v46 }
 0x125   :  { %v665_v12 = vsub.f32 %v1331_v3, %v628_v54 }
 0x126   :  { %683 = vst.msk [vmem:[#allocation7 + $0x2e0] sm:$0xff] %vm153_vm0, %v666_v55 }
 0x127   :  { %682 = vst.msk [vmem:[#allocation7 + $0x2a0] sm:$0xff] %vm153_vm0, %v665_v12  ;;  %v634_v22 = vpop.permute.xlu1 %633 }
 0x128   :  { %v632_v23 = vpop.permute.xlu0 %631  ;;  %v668_v13 = vsub.f32 %v1341_v0, %v634_v22 }
 0x129   :  { %v667_v6 = vsub.f32 %v1343_v2, %v632_v23 }
 0x12a   :  { %685 = vst.msk [vmem:[#allocation7 + $0x360] sm:$0xff] %vm153_vm0, %v668_v13 }
 0x12b   :  { %684 = vst.msk [vmem:[#allocation7 + $0x320] sm:$0xff] %vm153_vm0, %v667_v6  ;;  %v638_v33 = vpop.permute.xlu1 %637 }
 0x12c   :  { %v636_v24 = vpop.permute.xlu0 %635  ;;  %v670_v7 = vsub.f32 %v1353_v4, %v638_v33 }
 0x12d   :  { %v669_v14 = vsub.f32 %v1355_v5, %v636_v24 }
 0x12e   :  { %687 = vst.msk [vmem:[#allocation7 + $0x3e0] sm:$0xff] %vm153_vm0, %v670_v7 }
 0x12f   :  { %686 = vst.msk [vmem:[#allocation7 + $0x3a0] sm:$0xff] %vm153_vm0, %v669_v14  ;;  %v739_v15 = vpop.permute.xlu1 %738 }
 0x130   :  { %v737_v56 = vpop.permute.xlu0 %736  ;;  %v785_v25 = vsub.f32 %v1281_v50, %v739_v15 }
 0x131   :  { %v784_v34 = vsub.f32 %v1273_v59, %v737_v56 }
 0x132   :  { %802 = vst.msk [vmem:[#allocation7 + $0x68] sm:$0xff] %vm153_vm0, %v785_v25 }
 0x133   :  { %801 = vst.msk [vmem:[#allocation7 + $0x28] sm:$0xff] %vm153_vm0, %v784_v34  ;;  %v743_v35 = vpop.permute.xlu1 %742 }
 0x134   :  { %v741_v37 = vpop.permute.xlu0 %740  ;;  %v787_v28 = vsub.f32 %v1279_v49, %v743_v35 }
 0x135   :  { %v786_v29 = vsub.f32 %v1271_v58, %v741_v37 }
 0x136   :  { %804 = vst.msk [vmem:[#allocation7 + $0xe8] sm:$0xff] %vm153_vm0, %v787_v28 }
 0x137   :  { %803 = vst.msk [vmem:[#allocation7 + $0xa8] sm:$0xff] %vm153_vm0, %v786_v29  ;;  %v747_v62 = vpop.permute.xlu1 %746 }
 0x138   :  { %v745_v63 = vpop.permute.xlu0 %744  ;;  %v789_v50 = vsub.f32 %v1289_v57, %v747_v62 }
 0x139   :  { %v788_v59 = vsub.f32 %v1291_v60, %v745_v63 }
 0x13a   :  { %806 = vst.msk [vmem:[#allocation7 + $0x168] sm:$0xff] %vm153_vm0, %v789_v50 }
 0x13b   :  { %805 = vst.msk [vmem:[#allocation7 + $0x128] sm:$0xff] %vm153_vm0, %v788_v59  ;;  %v751_v16 = vpop.permute.xlu1 %750 }
 0x13c   :  { %v749_v61 = vpop.permute.xlu0 %748  ;;  %v791_v49 = vsub.f32 %v1305_v52, %v751_v16 }
 0x13d   :  { %v790_v58 = vsub.f32 %v1307_v53, %v749_v61 }
 0x13e   :  { %808 = vst.msk [vmem:[#allocation7 + $0x1e8] sm:$0xff] %vm153_vm0, %v791_v49 }
 0x13f   :  { %807 = vst.msk [vmem:[#allocation7 + $0x1a8] sm:$0xff] %vm153_vm0, %v790_v58  ;;  %v755_v36 = vpop.permute.xlu1 %754 }
 0x140   :  { %v753_v17 = vpop.permute.xlu0 %752  ;;  %v793_v57 = vsub.f32 %v1317_v32, %v755_v36 }
 0x141   :  { %v792_v60 = vsub.f32 %v1319_v31, %v753_v17 }
 0x142   :  { %810 = vst.msk [vmem:[#allocation7 + $0x268] sm:$0xff] %vm153_vm0, %v793_v57 }
 0x143   :  { %809 = vst.msk [vmem:[#allocation7 + $0x228] sm:$0xff] %vm153_vm0, %v792_v60  ;;  %v759_v39 = vpop.permute.xlu1 %758 }
 0x144   :  { %v757_v38 = vpop.permute.xlu0 %756  ;;  %v795_v52 = vsub.f32 %v1329_v1, %v759_v39 }
 0x145   :  { %v794_v53 = vsub.f32 %v1331_v3, %v757_v38 }
 0x146   :  { %812 = vst.msk [vmem:[#allocation7 + $0x2e8] sm:$0xff] %vm153_vm0, %v795_v52 }
 0x147   :  { %811 = vst.msk [vmem:[#allocation7 + $0x2a8] sm:$0xff] %vm153_vm0, %v794_v53  ;;  %v763_v41 = vpop.permute.xlu1 %762 }
 0x148   :  { %v761_v8 = vpop.permute.xlu0 %760  ;;  %v797_v32 = vsub.f32 %v1341_v0, %v763_v41 }
 0x149   :  { %v796_v31 = vsub.f32 %v1343_v2, %v761_v8 }
 0x14a   :  { %814 = vst.msk [vmem:[#allocation7 + $0x368] sm:$0xff] %vm153_vm0, %v797_v32 }
 0x14b   :  { %813 = vst.msk [vmem:[#allocation7 + $0x328] sm:$0xff] %vm153_vm0, %v796_v31  ;;  %v767_v30 = vpop.permute.xlu1 %766 }
 0x14c   :  { %v765_v1 = vpop.permute.xlu0 %764  ;;  %v799_v3 = vsub.f32 %v1353_v4, %v767_v30 }
 0x14d   :  { %v798_v9 = vsub.f32 %v1355_v5, %v765_v1 }
 0x14e   :  { %816 = vst.msk [vmem:[#allocation7 + $0x3e8] sm:$0xff] %vm153_vm0, %v799_v3 }
 0x14f   :  { %815 = vst.msk [vmem:[#allocation7 + $0x3a8] sm:$0xff] %vm153_vm0, %v798_v9 }
 0x150   :  { %1023 = shalt.err (!%p1020_p0)
}
 0x151   :  { %958 = dma.vmem_to_hbm [thread:$0]  %s953_s22, 16384, %s1687_s2, [#allocation4], %s1039_s12, %s1039_s12, %s1040_s13  }
 0x152   :  { %1036 = dma.done.wait [#allocation4], 16384  }
 0x153   :  { %1037 = vsyncadd [#allocation4], 4294950912 }
 0x154   :  { %962 = vsyncpa [#allocation3], 1 }
 0x155   :  { %963 = vsyncpa [#allocation6], 1 }
 0x156   :  { %964 = vsyncpa [#allocation4], 1 }

</bundles_post_ra>
